<compile_context>
chip_gen: v6e
topology: v6e:2x2x1
jax: 0.10.0
libtpu: 0.0.40
codegen_flags: <defaults>
</compile_context>

<pallas_src>
import math
from functools import partial

import jax
import jax.numpy as jnp
from jax import lax
from jax.experimental import pallas as pl
from jax.experimental.pallas import tpu as pltpu

_LANES = 128


# ----------------------------------------------------------------------------
# Kernels
# ----------------------------------------------------------------------------
def _mixpool_kernel_folded(x_ref, w_ref, b_ref, o_ref, sum_acc, max_acc, *,
                           avg_channels, channels, s_total, f_total, block_f):
    """Lane-dense path. x_ref: [bn, block_f, 128]; lane L = (spatial L//C, channel L%C)."""
    r = pl.program_id(1)

    @pl.when(r == 0)
    def _init():
        sum_acc[...] = jnp.zeros(sum_acc.shape, jnp.float32)
        max_acc[...] = jnp.full(max_acc.shape, -jnp.inf, jnp.float32)

    x = x_ref[...].astype(jnp.float32)                 # per-tile cast, hidden under DMA
    bn, bf, lanes = x.shape
    row = lax.broadcasted_iota(jnp.int32, (bn, bf, lanes), 1) + r * block_f
    valid = row < f_total                              # mask padded folded rows
    sum_acc[...] += jnp.sum(jnp.where(valid, x, 0.0), axis=1)
    max_acc[...] = jnp.maximum(max_acc[...],
                               jnp.max(jnp.where(valid, x, -jnp.inf), axis=1))

    @pl.when(r == pl.num_programs(1) - 1)
    def _finalize():
        ssum = sum_acc[...]
        smax = max_acc[...]
        # Strided-lane reduction tree (XLU): after log2(128 // C) rotations,
        # every lane L holds the full spatial reduction of channel (L % C).
        shift = channels
        while shift < _LANES:
            ssum = ssum + pltpu.roll(ssum, shift=shift, axis=1)
            smax = jnp.maximum(smax, pltpu.roll(smax, shift=shift, axis=1))
            shift *= 2
        mean = ssum * (1.0 / s_total)
        lane = lax.broadcasted_iota(jnp.int32, mean.shape, 1)
        y = jnp.where(lane % channels < avg_channels, mean, smax)
        y = jnp.tanh(y)
        # Only lanes [0, C) feed the (zero-padded) [128, K] weight; this keeps
        # the matmul lane-dense instead of slicing a narrow [bn, C] block.
        y = jnp.where(lane < channels, y, 0.0)
        o_ref[...] = (jnp.dot(y, w_ref[...], preferred_element_type=jnp.float32)
                      + b_ref[...])


def _mixpool_kernel_general(x_ref, w_ref, b_ref, o_ref, sum_acc, max_acc, *,
                            avg_channels, s_total, block_s):
    """Fallback path. x_ref: [bn, block_s, C] channels-last tile."""
    r = pl.program_id(1)

    @pl.when(r == 0)
    def _init():
        sum_acc[...] = jnp.zeros(sum_acc.shape, jnp.float32)
        max_acc[...] = jnp.full(max_acc.shape, -jnp.inf, jnp.float32)

    x = x_ref[...].astype(jnp.float32)
    bn, bs, c = x.shape
    row = lax.broadcasted_iota(jnp.int32, (bn, bs, c), 1) + r * block_s
    valid = row < s_total                              # mask padded spatial rows
    # TODO(synk): for very large C, split the mean/max reductions at a
    # 128-lane-aligned channel boundary instead of running both over all C.
    sum_acc[...] += jnp.sum(jnp.where(valid, x, 0.0), axis=1)
    max_acc[...] = jnp.maximum(max_acc[...],
                               jnp.max(jnp.where(valid, x, -jnp.inf), axis=1))

    @pl.when(r == pl.num_programs(1) - 1)
    def _finalize():
        mean = sum_acc[...] * (1.0 / s_total)
        ch = lax.broadcasted_iota(jnp.int32, mean.shape, 1)
        y = jnp.tanh(jnp.where(ch < avg_channels, mean, max_acc[...]))
        o_ref[...] = (jnp.dot(y, w_ref[...], preferred_element_type=jnp.float32)
                      + b_ref[...])


# ----------------------------------------------------------------------------
# Host wrapper
# ----------------------------------------------------------------------------
def _pick_block(full, preferred, align):
    """Largest tile <= preferred that is a multiple of align, or the full extent."""
    if full <= preferred:
        return full
    blk = (preferred // align) * align
    if blk < align:
        return full
    return blk


def mixpool_classification_head(x, w, b, avg_channels, *, block_n=None,
                                block_r=None):
    """x: [N, *spatial, C] channels-last (native dtype). w: [C, K]. b: [K]."""
    n = x.shape[0]
    c = x.shape[-1]
    k = w.shape[-1]
    s = 1
    for d in x.shape[1:-1]:
        s *= d
    assert 0 <= avg_channels <= c, "mean channels must be a prefix of [0, C)"

    w32 = w.astype(jnp.float32)
    b2 = b.reshape(1, k).astype(jnp.float32)

    if block_n is None:
        block_n = _pick_block(n, 64, 8)

    itemsize = x.dtype.itemsize
    sub_align = 32 // itemsize                 # 8 for f32, 16 for bf16, 32 for int8
    budget = 4 * 1024 * 1024                   # bytes per (double-buffered) input tile

    folded = (c <= _LANES) and (_LANES % c == 0) and ((s * c) % _LANES == 0)

    if folded:
        # Fold spatial into the 128-lane axis: free contiguous reshape.
        f_total = (s * c) // _LANES
        x_r = x.reshape(n, f_total, _LANES)
        # Zero-padded [128, K] weights keep the finalize matmul lane-dense.
        w_in = jnp.zeros((_LANES, k), jnp.float32).at[:c, :].set(w32)
        if block_r is None:
            per_row = block_n * _LANES * itemsize
            block_r = _pick_block(f_total, max(sub_align, budget // per_row),
                                  sub_align)
        grid = (pl.cdiv(n, block_n), pl.cdiv(f_total, block_r))
        kernel = partial(_mixpool_kernel_folded, avg_channels=avg_channels,
                         channels=c, s_total=s, f_total=f_total, block_f=block_r)
        x_spec = pl.BlockSpec((block_n, block_r, _LANES), lambda i, r: (i, r, 0))
        acc_shape = (block_n, _LANES)
    else:
        x_r = x.reshape(n, s, c)
        w_in = w32
        c_pad = ((c + _LANES - 1) // _LANES) * _LANES
        if block_r is None:
            per_row = block_n * c_pad * 4
            block_r = _pick_block(s, max(sub_align, budget // per_row), sub_align)
        grid = (pl.cdiv(n, block_n), pl.cdiv(s, block_r))
        kernel = partial(_mixpool_kernel_general, avg_channels=avg_channels,
                         s_total=s, block_s=block_r)
        x_spec = pl.BlockSpec((block_n, block_r, c), lambda i, r: (i, r, 0))
        acc_shape = (block_n, c)

    return pl.pallas_call(
        kernel,
        out_shape=jax.ShapeDtypeStruct((n, k), jnp.float32),
        grid_spec=pltpu.PrefetchScalarGridSpec(
            num_scalar_prefetch=0,
            grid=grid,
            in_specs=[
                x_spec,
                pl.BlockSpec(w_in.shape, lambda i, r: (0, 0)),   # resident weights
                pl.BlockSpec((1, k), lambda i, r: (0, 0)),       # resident bias
            ],
            out_specs=pl.BlockSpec((block_n, k), lambda i, r: (i, 0)),
            scratch_shapes=[pltpu.VMEM(acc_shape, jnp.float32),   # running sum
                            pltpu.VMEM(acc_shape, jnp.float32)],  # running max
        ),
        compiler_params=pltpu.CompilerParams(
            dimension_semantics=("parallel", "arbitrary"),
            vmem_limit_bytes=32 * 1024 * 1024,
        ),
    )(x_r, w_in, b2)


# ----------------------------------------------------------------------------
# Pure-JAX reference
# ----------------------------------------------------------------------------
def reference(x, w, b, avg_channels):
    spatial_axes = tuple(range(1, x.ndim - 1))
    avg = jnp.mean(x[..., :avg_channels], axis=spatial_axes)
    mx = jnp.max(x[..., avg_channels:], axis=spatial_axes)
    y = jnp.tanh(jnp.concatenate([avg, mx], axis=-1))
    return y @ w + b


if __name__ == "__main__":
    key = jax.random.PRNGKey(0)
    k1, k2, k3, k4 = jax.random.split(key, 4)

    # Config 1: MixPoolClassificationHead(ndim=2, in_channels=8, num_classes=4,
    # avg_ratio=0.5); channels-last input [N, H, W, C] -> lane-folded path.
    in_channels, num_classes = 8, 4
    avg_channels = int(0.5 * in_channels)
    batch, spatial = 2, 16

    x = jax.random.normal(k1, (batch, spatial, spatial, in_channels), jnp.float32)
    bound = 1.0 / math.sqrt(in_channels)
    w = jax.random.uniform(k2, (in_channels, num_classes), jnp.float32, -bound, bound)
    b = jax.random.uniform(k3, (num_classes,), jnp.float32, -bound, bound)

    out = mixpool_classification_head(x, w, b, avg_channels, block_r=8)
    out = jax.block_until_ready(out)
    ref = reference(x, w, b, avg_channels)
    assert out.shape == (batch, num_classes)
    assert jnp.allclose(out, ref, atol=1e-5, rtol=1e-5)

    # Config 2: exercises the general (non-folded) path, spatial masking
    # (S=25 not a multiple of the 16-row tile) and the in-kernel bf16->f32 cast.
    c2, ncls2, sp2, n2 = 12, 3, 5, 3
    kx, kw, kb = jax.random.split(k4, 3)
    x2 = jax.random.normal(kx, (n2, sp2, sp2, c2), jnp.float32).astype(jnp.bfloat16)
    bound2 = 1.0 / math.sqrt(c2)
    w2 = jax.random.uniform(kw, (c2, ncls2), jnp.float32, -bound2, bound2)
    b2 = jax.random.uniform(kb, (ncls2,), jnp.float32, -bound2, bound2)
    avg2 = int(0.5 * c2)

    out2 = mixpool_classification_head(x2, w2, b2, avg2, block_r=16)
    out2 = jax.block_until_ready(out2)
    ref2 = reference(x2.astype(jnp.float32), w2, b2, avg2)
    assert out2.shape == (n2, ncls2)
    assert jnp.allclose(out2, ref2, atol=1e-3, rtol=1e-3)

    print("KERNEL_OK")
</pallas_src>

<mosaic_0001>
module attributes {stable_mosaic.version = 11 : i64} {
  func.func @_mixpool_kernel_folded(%arg0: i32, %arg1: i32, %arg2: memref<2x8x128xf32, #tpu.memory_space<vmem>>, %arg3: memref<128x4xf32, #tpu.memory_space<vmem>>, %arg4: memref<1x4xf32, #tpu.memory_space<vmem>>, %arg5: memref<2x4xf32, #tpu.memory_space<vmem>>, %arg6: memref<2x128xf32, #tpu.memory_space<vmem>>, %arg7: memref<2x128xf32, #tpu.memory_space<vmem>>) attributes {dimension_semantics = [#tpu.dimension_semantics<parallel>, #tpu.dimension_semantics<arbitrary>], iteration_bounds = array<i64: 1, 2>, scalar_prefetch = 0 : i64, scratch_operands = 2 : i64, tpu.core_type = #tpu.core_type<tc>, window_params = [{transform_indices = @transform_0, window_bounds = array<i64: 2, 8, 128>}, {pipeline_mode = #tpu.pipeline_mode<synchronous>, transform_indices = @transform_1, window_bounds = array<i64: 128, 4>}, {pipeline_mode = #tpu.pipeline_mode<synchronous>, transform_indices = @transform_2, window_bounds = array<i64: 1, 4>}, {transform_indices = @transform_3, window_bounds = array<i64: 2, 4>}]} {
    %c0_i32 = arith.constant 0 : i32
    %0 = arith.cmpi eq, %arg1, %c0_i32 : i32
    %1 = arith.extui %0 : i1 to i32
    %c0_i32_0 = arith.constant 0 : i32
    %2 = arith.cmpi ne, %1, %c0_i32_0 : i32
    scf.if %2 {
      %cst_15 = arith.constant 0.000000e+00 : f32
      %25 = vector.broadcast %cst_15 : f32 to vector<2x128xf32>
      %c0_16 = arith.constant 0 : index
      %c0_17 = arith.constant 0 : index
      %26 = vector.load %arg6[%c0_16, %c0_17] : memref<2x128xf32, #tpu.memory_space<vmem>>, vector<2x128xf32>
      tpu.vector_store %arg6[%c0_16, %c0_17], %25 {strides = array<i32>} : memref<2x128xf32, #tpu.memory_space<vmem>>, vector<2x128xf32>,
      %cst_18 = arith.constant 0xFF800000 : f32
      %27 = vector.broadcast %cst_18 : f32 to vector<2x128xf32>
      %c0_19 = arith.constant 0 : index
      %c0_20 = arith.constant 0 : index
      %28 = vector.load %arg7[%c0_19, %c0_20] : memref<2x128xf32, #tpu.memory_space<vmem>>, vector<2x128xf32>
      tpu.vector_store %arg7[%c0_19, %c0_20], %27 {strides = array<i32>} : memref<2x128xf32, #tpu.memory_space<vmem>>, vector<2x128xf32>,
    } else {
    }
    %c0 = arith.constant 0 : index
    %c0_1 = arith.constant 0 : index
    %c0_2 = arith.constant 0 : index
    %3 = vector.load %arg2[%c0, %c0_1, %c0_2] : memref<2x8x128xf32, #tpu.memory_space<vmem>>, vector<2x8x128xf32>
    %4 = tpu.iota {dimensions = array<i32: 1>} : vector<2x8x128xi32>
    %c8_i32 = arith.constant 8 : i32
    %5 = arith.muli %arg1, %c8_i32 : i32
    %6 = vector.broadcast %5 : i32 to vector<2x8x128xi32>
    %7 = arith.addi %4, %6 : vector<2x8x128xi32>
    %c16_i32 = arith.constant 16 : i32
    %8 = vector.broadcast %c16_i32 : i32 to vector<2x8x128xi32>
    %9 = arith.cmpi slt, %7, %8 : vector<2x8x128xi32>
    %c0_3 = arith.constant 0 : index
    %c0_4 = arith.constant 0 : index
    %10 = vector.load %arg6[%c0_3, %c0_4] : memref<2x128xf32, #tpu.memory_space<vmem>>, vector<2x128xf32>
    %cst = arith.constant 0.000000e+00 : f32
    %11 = vector.broadcast %cst : f32 to vector<2x8x128xf32>
    %12 = arith.select %9, %3, %11 : vector<2x8x128xi1>, vector<2x8x128xf32>
    %cst_5 = arith.constant dense<0.000000e+00> : vector<2x128xf32>
    %13 = vector.multi_reduction <add>, %12, %cst_5 [1] : vector<2x8x128xf32> to vector<2x128xf32>
    %14 = arith.addf %10, %13 : vector<2x128xf32>
    %c0_6 = arith.constant 0 : index
    %c0_7 = arith.constant 0 : index
    %15 = vector.load %arg6[%c0_6, %c0_7] : memref<2x128xf32, #tpu.memory_space<vmem>>, vector<2x128xf32>
    tpu.vector_store %arg6[%c0_6, %c0_7], %14 {strides = array<i32>} : memref<2x128xf32, #tpu.memory_space<vmem>>, vector<2x128xf32>,
    %c0_8 = arith.constant 0 : index
    %c0_9 = arith.constant 0 : index
    %16 = vector.load %arg7[%c0_8, %c0_9] : memref<2x128xf32, #tpu.memory_space<vmem>>, vector<2x128xf32>
    %cst_10 = arith.constant 0xFF800000 : f32
    %17 = vector.broadcast %cst_10 : f32 to vector<2x8x128xf32>
    %18 = arith.select %9, %3, %17 : vector<2x8x128xi1>, vector<2x8x128xf32>
    %cst_11 = arith.constant dense<0xFF800000> : vector<2x128xf32>
    %19 = vector.multi_reduction <maximumf>, %18, %cst_11 [1] : vector<2x8x128xf32> to vector<2x128xf32>
    %20 = arith.maximumf %16, %19 : vector<2x128xf32>
    %c0_12 = arith.constant 0 : index
    %c0_13 = arith.constant 0 : index
    %21 = vector.load %arg7[%c0_12, %c0_13] : memref<2x128xf32, #tpu.memory_space<vmem>>, vector<2x128xf32>
    tpu.vector_store %arg7[%c0_12, %c0_13], %20 {strides = array<i32>} : memref<2x128xf32, #tpu.memory_space<vmem>>, vector<2x128xf32>,
    %c1_i32 = arith.constant 1 : i32
    %22 = arith.cmpi eq, %arg1, %c1_i32 : i32
    %23 = arith.extui %22 : i1 to i32
    %c0_i32_14 = arith.constant 0 : i32
    %24 = arith.cmpi ne, %23, %c0_i32_14 : i32
    scf.if %24 {
      %c0_15 = arith.constant 0 : index
      %c0_16 = arith.constant 0 : index
      %25 = vector.load %arg6[%c0_15, %c0_16] : memref<2x128xf32, #tpu.memory_space<vmem>>, vector<2x128xf32>
      %c0_17 = arith.constant 0 : index
      %c0_18 = arith.constant 0 : index
      %26 = vector.load %arg7[%c0_17, %c0_18] : memref<2x128xf32, #tpu.memory_space<vmem>>, vector<2x128xf32>
      %c8_i32_19 = arith.constant 8 : i32
      %27 = tpu.dynamic_rotate %25 by %c8_i32_19 dim 1 : vector<2x128xf32>, i32 -> vector<2x128xf32>
      %28 = arith.addf %25, %27 : vector<2x128xf32>
      %c8_i32_20 = arith.constant 8 : i32
      %29 = tpu.dynamic_rotate %26 by %c8_i32_20 dim 1 : vector<2x128xf32>, i32 -> vector<2x128xf32>
      %30 = arith.maximumf %26, %29 : vector<2x128xf32>
      %c16_i32_21 = arith.constant 16 : i32
      %31 = tpu.dynamic_rotate %28 by %c16_i32_21 dim 1 : vector<2x128xf32>, i32 -> vector<2x128xf32>
      %32 = arith.addf %28, %31 : vector<2x128xf32>
      %c16_i32_22 = arith.constant 16 : i32
      %33 = tpu.dynamic_rotate %30 by %c16_i32_22 dim 1 : vector<2x128xf32>, i32 -> vector<2x128xf32>
      %34 = arith.maximumf %30, %33 : vector<2x128xf32>
      %c32_i32 = arith.constant 32 : i32
      %35 = tpu.dynamic_rotate %32 by %c32_i32 dim 1 : vector<2x128xf32>, i32 -> vector<2x128xf32>
      %36 = arith.addf %32, %35 : vector<2x128xf32>
      %c32_i32_23 = arith.constant 32 : i32
      %37 = tpu.dynamic_rotate %34 by %c32_i32_23 dim 1 : vector<2x128xf32>, i32 -> vector<2x128xf32>
      %38 = arith.maximumf %34, %37 : vector<2x128xf32>
      %c64_i32 = arith.constant 64 : i32
      %39 = tpu.dynamic_rotate %36 by %c64_i32 dim 1 : vector<2x128xf32>, i32 -> vector<2x128xf32>
      %40 = arith.addf %36, %39 : vector<2x128xf32>
      %c64_i32_24 = arith.constant 64 : i32
      %41 = tpu.dynamic_rotate %38 by %c64_i32_24 dim 1 : vector<2x128xf32>, i32 -> vector<2x128xf32>
      %42 = arith.maximumf %38, %41 : vector<2x128xf32>
      %cst_25 = arith.constant 3.906250e-03 : f32
      %43 = vector.broadcast %cst_25 : f32 to vector<2x128xf32>
      %44 = arith.mulf %40, %43 : vector<2x128xf32>
      %45 = tpu.iota {dimensions = array<i32: 1>} : vector<2x128xi32>
      %c8_i32_26 = arith.constant 8 : i32
      %c0_i32_27 = arith.constant 0 : i32
      %46 = arith.cmpi eq, %c8_i32_26, %c0_i32_27 : i32
      %c1_i32_28 = arith.constant 1 : i32
      %47 = arith.select %46, %c1_i32_28, %c8_i32_26 : i32
      %48 = vector.broadcast %47 : i32 to vector<2x128xi32>
      %49 = arith.remsi %45, %48 : vector<2x128xi32>
      %c0_i32_29 = arith.constant 0 : i32
      %50 = vector.broadcast %c0_i32_29 : i32 to vector<2x128xi32>
      %51 = arith.cmpi ne, %49, %50 : vector<2x128xi32>
      %c0_i32_30 = arith.constant 0 : i32
      %52 = vector.broadcast %c0_i32_30 : i32 to vector<2x128xi32>
      %53 = arith.cmpi slt, %49, %52 : vector<2x128xi32>
      %c0_i32_31 = arith.constant 0 : i32
      %54 = arith.cmpi slt, %47, %c0_i32_31 : i32
      %55 = vector.broadcast %54 : i1 to vector<2x128xi1>
      %56 = vector.broadcast %55 : vector<2x128xi1> to vector<2x128xi1>
      %57 = arith.xori %53, %56 : vector<2x128xi1>
      %58 = arith.andi %57, %51 : vector<2x128xi1>
      %59 = vector.broadcast %47 : i32 to vector<2x128xi32>
      %60 = arith.addi %49, %59 : vector<2x128xi32>
      %61 = arith.select %58, %60, %49 : vector<2x128xi1>, vector<2x128xi32>
      %c4_i32 = arith.constant 4 : i32
      %62 = vector.broadcast %c4_i32 : i32 to vector<2x128xi32>
      %63 = arith.cmpi slt, %61, %62 : vector<2x128xi32>
      %64 = arith.select %63, %44, %42 : vector<2x128xi1>, vector<2x128xf32>
      %65 = math.tanh %64 : vector<2x128xf32>
      %c8_i32_32 = arith.constant 8 : i32
      %66 = vector.broadcast %c8_i32_32 : i32 to vector<2x128xi32>
      %67 = arith.cmpi slt, %45, %66 : vector<2x128xi32>
      %cst_33 = arith.constant 0.000000e+00 : f32
      %68 = vector.broadcast %cst_33 : f32 to vector<2x128xf32>
      %69 = arith.select %67, %65, %68 : vector<2x128xi1>, vector<2x128xf32>
      %c0_34 = arith.constant 0 : index
      %c0_35 = arith.constant 0 : index
      %70 = vector.load %arg3[%c0_34, %c0_35] : memref<128x4xf32, #tpu.memory_space<vmem>>, vector<128x4xf32>
      %cst_36 = arith.constant dense<0.000000e+00> : vector<2x4xf32>
      %71 = tpu.matmul %69, %70, %cst_36 {dimension_numbers = #tpu.dot_dimension_numbers<[1], [0], [0], [1], [0, 0, 1, 1], [], []>} : vector<2x128xf32>, vector<128x4xf32>, vector<2x4xf32> -> vector<2x4xf32>
      %c0_37 = arith.constant 0 : index
      %c0_38 = arith.constant 0 : index
      %72 = vector.load %arg4[%c0_37, %c0_38] : memref<1x4xf32, #tpu.memory_space<vmem>>, vector<1x4xf32>
      %73 = vector.broadcast %72 : vector<1x4xf32> to vector<2x4xf32>
      %74 = arith.addf %71, %73 : vector<2x4xf32>
      %c0_39 = arith.constant 0 : index
      %c0_40 = arith.constant 0 : index
      %75 = vector.load %arg5[%c0_39, %c0_40] : memref<2x4xf32, #tpu.memory_space<vmem>>, vector<2x4xf32>
      tpu.vector_store %arg5[%c0_39, %c0_40], %74 {strides = array<i32>} : memref<2x4xf32, #tpu.memory_space<vmem>>, vector<2x4xf32>,
    } else {
    }
    return
  }
  func.func @transform_0(%arg0: i32, %arg1: i32) -> (i32, i32, i32) {
    %c0_i32 = arith.constant 0 : i32
    %c0_i32_0 = arith.constant 0 : i32
    return %arg0, %arg1, %c0_i32 : i32, i32, i32
  }
  func.func @transform_1(%arg0: i32, %arg1: i32) -> (i32, i32) {
    %c0_i32 = arith.constant 0 : i32
    %c0_i32_0 = arith.constant 0 : i32
    %c0_i32_1 = arith.constant 0 : i32
    return %c0_i32, %c0_i32_0 : i32, i32
  }
  func.func @transform_2(%arg0: i32, %arg1: i32) -> (i32, i32) {
    %c0_i32 = arith.constant 0 : i32
    %c0_i32_0 = arith.constant 0 : i32
    %c0_i32_1 = arith.constant 0 : i32
    return %c0_i32, %c0_i32_0 : i32, i32
  }
  func.func @transform_3(%arg0: i32, %arg1: i32) -> (i32, i32) {
    %c0_i32 = arith.constant 0 : i32
    %c0_i32_0 = arith.constant 0 : i32
    return %arg0, %c0_i32 : i32, i32
  }
}

</mosaic_0001>

<bundles_post_ra>
// kernel: tpu_custom_call.1
= control target key start
LH: loop header
LB: loop body
LE: loop exit
PB: predicated region body
PF: predicated region fallthrough
CT: control target
= control target key end

     0   :  { %8 = vsyncpa [#allocation6], 0  ;;  %s710_s12 = smov 0   ;;  %s712_s13 = smov 0   ;;  %s845_s0 = inlined_call_operand.vmem [shape: f32[2,16,128], index: 0, kind: input, shape index: {}]   ;;  %s846_s1 = inlined_call_operand.vmem [shape: f32[128,4], index: 1, kind: input, shape index: {}]   ;;  %s847_s2 = inlined_call_operand.vmem [shape: f32[1,4], index: 2, kind: input, shape index: {}]   ;;  %s848_s3 = inlined_call_operand.hbm [shape: f32[2,4], index: 3, kind: output, shape index: {}]  }
   0x1   :  { %s714_s14 = smov 0   ;;  %s716_s15 = smov 0  }
   0x2   :  { %s718_s16 = smov 0  }
   0x3 LB: > { %s488_s17 = sadd.s32 4294967295, %s679_s16   ;;  %s23_s18 = sadd.s32 1, %s675_s15  ;;  %s679_s16 = sphi %s718_s16, %s14_s16   ;;  %s675_s15 = sphi %s716_s15, %s853_s15   ;;  %s671_s14 = sphi %s714_s14, %s852_s14   ;;  %s667_s13 = sphi %s712_s13, %s851_s13   ;;  %s663_s12 = sphi %s710_s12, %s850_s12  }
   0x4   : > { %p24_p0 = scmp.ge.s32.totalorder %s23_s18, 2  ;;  %p42_p1 = scmp.ne.s32.totalorder %s667_s13, %s663_s12 }
   0x5   : > { %p43_p2 = scmp.eq.s32.totalorder %s679_s16, 0  ;;  %s35_s20 = sadd.s32 1, %s667_s13 }
   0x6   : > { %s855_s18 = smov (%p24_p0, %s23_s18), 0  ;;  %p490_p5 = scmp.ge.s32.totalorder %s679_s16, 2 }
   0x7   : > { %p44_p3 = por %p43_p2, %p42_p1  ;;  %s31_s19 = ssub.s32 %s675_s15, %s855_s18 }
   0x8   : > { %p33_p4 = scmp.eq.s32.totalorder %s31_s19, 0  ;;  %142 = sbr.rel (%p490_p5) target bundleno = 18 (0x12), region = 24 }
   0xa   : > { %s746_s21 = scalar_select %p33_p4, %s667_s13, %s35_s20  }
   0xd   : > { %145 = sbr.rel (!%p44_p3) target bundleno = 18 (0x12), region = 28  ;;  %s147_s22 = sand.u32 (%p44_p3), 1, %s667_s13  }
   0xe   : > { %s492_s23 = sshll.u32 (%p44_p3), %s675_s15, 3  ;;  %s491_s24 = sshll.u32 (%p44_p3), %s147_s22, 4 }
   0xf   : > { %s154_s27 = scalar_lea.vmem (%p44_p3), %s845_s0, %s492_s23  ;;  %s149_s28 = scalar_lea.vmem (%p44_p3), [#allocation4], %s491_s24 }
  0x10   : > { %v185_v0 = vld [vmem:[%s154_s27] sm:$0xff] (%p44_p3)  ;;  %v187_v1 = vld [vmem:[%s154_s27 + $0x10] sm:$0xff] (%p44_p3) }
  0x11   : > { %186 = vst [vmem:[%s149_s28] sm:$0xff] (%p44_p3), %v185_v0  ;;  %188 = vst [vmem:[%s149_s28 + $0x8] sm:$0xff] (%p44_p3), %v187_v1 }
  0x12 PF: > { %p493_p6 = scmp.ge.s32.totalorder %s679_s16, 1  ;;  %p193_p7 = scmp.lt.s32.totalorder %s679_s16, 3 }
  0x14   : > { %p194_p8 = pnand %p493_p6, %p193_p7 }
  0x15   : > { %s200_s29 = sand.u32 (!%p194_p8), 1, %s663_s12   ;;  %p495_p9 = scmp.ne.s32.totalorder (!%p194_p8), %s671_s14, 0 }
  0x16   : > { %197 = sbr.rel (%p194_p8) target bundleno = 763 (0x2fb), region = 66  ;;  %s494_s30 = sshll.u32 (!%p194_p8), %s200_s29, 4 }
  0x17   : > { %s202_s4 = scalar_lea.vmem (!%p194_p8), [#allocation4], %s494_s30 }
  0x1b   : > { %222 = sbr.rel (%p495_p9) target bundleno = 34 (0x22), region = 74 }
  0x20   : > { %v681_v2 = vmov 0.0   ;;  %v682_v3 = vmov -inf  }
  0x21   : > { %223 = vst [vmem:[#allocation2] sm:$0x3] %v681_v2  ;;  %224 = vst [vmem:[#allocation3] sm:$0x3] %v682_v3 }
  0x22 PF: > { %v227_v4 = vlaneseq  ;;  %s496_s5 = sshll.u32 %s671_s14, 3  ;;  %v225_v7 = vld [vmem:[%s202_s4] sm:$0xff]  ;;  %v226_v8 = vld [vmem:[%s202_s4 + $0x8] sm:$0xff]  ;;  %vm250_vm1 = vcmask 1041409   ;;  %p497_p10 = scmp.ne.s32.totalorder %s671_s14, 1 }
  0x23   : > { %v230_v5 = vstv %s496_s5  ;;  %s683_s6 = smov (!%p497_p10), 8   ;;  %s684_s7 = smov (!%p497_p10), 16  }
  0x24   : > { %v228_v6 = vshrl.u32 %v227_v4, 7  ;;  %s686_s22 = smov (!%p497_p10), 32   ;;  %s688_s19 = smov (!%p497_p10), 64  }
  0x26   : > { %v231_v9 = vadd.s32 %v230_v5, %v228_v6 }
  0x28   : > { %vm232_vm0 = vcmp.lt.s32.totalorder %v231_v9, 16  ;;  %v233_v34 = vld [vmem:[#allocation2] sm:$0x3]  ;;  %v255_v37 = vld [vmem:[#allocation3] sm:$0x3] }
  0x29   : > { %v234_v10 = vsel %vm232_vm0, %v225_v7, 0.0  ;;  %v235_v11 = vsel %vm232_vm0, %v226_v8, 0.0  ;;  %v256_v12 = vsel %vm232_vm0, %v225_v7, -inf  ;;  %v257_v13 = vsel %vm232_vm0, %v226_v8, -inf }
  0x2a   : > { %v236_v14 = vrot.slane %v234_v10, 4  ;;  %v242_v15 = vrot.slane %v235_v11, 4  ;;  %v258_v16 = vrot.slane %v256_v12, 4  ;;  %v264_v17 = vrot.slane %v257_v13, 4 }
  0x2c   : > { %v237_v18 = vadd.f32 %v236_v14, %v234_v10  ;;  %v243_v19 = vadd.f32 %v242_v15, %v235_v11  ;;  %v259_v20 = vmax.f32 %v256_v12, %v258_v16  ;;  %v265_v21 = vmax.f32 %v257_v13, %v264_v17 }
  0x2e   : > { %v238_v22 = vrot.slane %v237_v18, 2  ;;  %v244_v23 = vrot.slane %v243_v19, 2  ;;  %v260_v24 = vrot.slane %v259_v20, 2  ;;  %v266_v25 = vrot.slane %v265_v21, 2 }
  0x30   : > { %v239_v26 = vadd.f32 %v238_v22, %v237_v18  ;;  %v245_v27 = vadd.f32 %v244_v23, %v243_v19  ;;  %v261_v28 = vmax.f32 %v259_v20, %v260_v24  ;;  %v267_v29 = vmax.f32 %v265_v21, %v266_v25 }
  0x32   : > { %v240_v30 = vrot.slane %v239_v26, 1  ;;  %v246_v31 = vrot.slane %v245_v27, 1  ;;  %v262_v32 = vrot.slane %v261_v28, 1  ;;  %v268_v33 = vrot.slane %v267_v29, 1 }
  0x34   : > { %v241_v35 = vadd.f32 %v240_v30, %v239_v26  ;;  %v247_v36 = vadd.f32 %v246_v31, %v245_v27  ;;  %v263_v38 = vmax.f32 %v261_v28, %v262_v32  ;;  %v269_v39 = vmax.f32 %v267_v29, %v268_v33 }
  0x35   : > { %279 = sbr.rel (%p497_p10) target bundleno = 748 (0x2ec), region = 78 }
  0x36   : > { %v251_v40 = vsel %vm250_vm1, %v247_v36, %v241_v35  ;;  %v272_v41 = vsel %vm250_vm1, %v269_v39, %v263_v38 }
  0x37   : > { %v253_v42 = vadd.f32 %v251_v40, %v233_v34  ;;  %v274_v43 = vmax.f32 %v255_v37, %v272_v41 }
  0x39   : > { %254 = vst [vmem:[#allocation2] sm:$0x3] %v253_v42  ;;  %275 = vst [vmem:[#allocation3] sm:$0x3] %v274_v43 }
  0x3a   : > { %v341_v50 = vld [vmem:[%s846_s1 + $0x78] sm:$0xff]  ;;  %v685_v51 = vmov 0.0   ;;  %v340_v52 = vld [vmem:[%s846_s1 + $0x70] sm:$0xff]  ;;  %v339_v53 = vld [vmem:[%s846_s1 + $0x68] sm:$0xff]  ;;  %vm687_vm2 = vmmov 0   ;;  %v308_v12 = vand.u32 127, %v227_v4 }
  0x3b   : > { %521 = vmatprep.subr.mxu0 %v685_v51  ;;  %v338_v56 = vld [vmem:[%s846_s1 + $0x60] sm:$0xff]  ;;  %v337_v57 = vld [vmem:[%s846_s1 + $0x58] sm:$0xff]  ;;  %v336_v60 = vld [vmem:[%s846_s1 + $0x50] sm:$0xff]  ;;  %553 = vmatprep.mubr.msk.f32.mxu0 %vm687_vm2, %v685_v51  ;;  %vm419_vm5 = vcmask 25600  }
  0x3c   : > { %522 = vmatpush3.msra.mxu0 %v341_v50  ;;  %v335_v61 = vld [vmem:[%s846_s1 + $0x48] sm:$0xff]  ;;  %v334_v62 = vld [vmem:[%s846_s1 + $0x40] sm:$0xff]  ;;  %v333_v63 = vld [vmem:[%s846_s1 + $0x38] sm:$0xff]  ;;  %v313_v14 = vand.u32 7, %v308_v12  ;;  %vm324_vm4 = vcmp.lt.s32.totalorder %v308_v12, 8 }
  0x3d   : > { %523 = vmatprep.subr.mxu0 %v685_v51  ;;  %v332_v0 = vld [vmem:[%s846_s1 + $0x30] sm:$0xff]  ;;  %v331_v1 = vld [vmem:[%s846_s1 + $0x28] sm:$0xff]  ;;  %v330_v2 = vld [vmem:[%s846_s1 + $0x20] sm:$0xff] }
  0x3e   : > { %524 = vmatpush3.msra.mxu0 %v340_v52  ;;  %v329_v6 = vld [vmem:[%s846_s1 + $0x18] sm:$0xff]  ;;  %v328_v7 = vld [vmem:[%s846_s1 + $0x10] sm:$0xff]  ;;  %v327_v10 = vld [vmem:[%s846_s1 + $0x8] sm:$0xff]  ;;  %vm321_vm3 = vcmp.lt.s32.totalorder %v313_v14, 4 }
  0x3f   : > { %525 = vmatprep.subr.mxu0 %v685_v51  ;;  %v326_v11 = vld [vmem:[%s846_s1] sm:$0xff] }
  0x40   : > { %v280_v44 = vld [vmem:[#allocation2] sm:$0x3]  ;;  %v281_v45 = vld [vmem:[#allocation3] sm:$0x3]  ;;  %526 = vmatpush3.msra.mxu0 %v339_v53 }
  0x41   : > { %282 = vrot.lane.b32.xlu0 %v280_v44, %s683_s6  ;;  %527 = vmatprep.subr.mxu0 %v685_v51  ;;  %v498_v21 = vld [vmem:[%s847_s2] ss:$0 sm:$0xff] }
  0x42   : > { %528 = vmatpush3.msra.mxu0 %v338_v56 }
  0x43   : > { %529 = vmatprep.subr.mxu0 %v685_v51 }
  0x44   : > { %530 = vmatpush3.msra.mxu0 %v337_v57 }
  0x45   : > { %285 = vrot.lane.b32.xlu0 %v281_v45, %s683_s6  ;;  %531 = vmatprep.subr.mxu0 %v685_v51 }
  0x46   : > { %532 = vmatpush3.msra.mxu0 %v336_v60 }
  0x47   : > { %533 = vmatprep.subr.mxu0 %v685_v51 }
  0x48   : > { %534 = vmatpush3.msra.mxu0 %v335_v61 }
  0x49   : > { %535 = vmatprep.subr.mxu0 %v685_v51 }
  0x4a   : > { %536 = vmatpush3.msra.mxu0 %v334_v62 }
  0x4b   : > { %537 = vmatprep.subr.mxu0 %v685_v51 }
  0x4c   : > { %538 = vmatpush3.msra.mxu0 %v333_v63 }
  0x4d   : > { %539 = vmatprep.subr.mxu0 %v685_v51 }
  0x4e   : > { %540 = vmatpush3.msra.mxu0 %v332_v0 }
  0x4f   : > { %541 = vmatprep.subr.mxu0 %v685_v51 }
  0x50   : > { %542 = vmatpush3.msra.mxu0 %v331_v1 }
  0x51   : > { %543 = vmatprep.subr.mxu0 %v685_v51 }
  0x52   : > { %544 = vmatpush3.msra.mxu0 %v330_v2 }
  0x53   : > { %545 = vmatprep.subr.mxu0 %v685_v51 }
  0x54   : > { %546 = vmatpush3.msra.mxu0 %v329_v6 }
  0x55   : > { %547 = vmatprep.subr.mxu0 %v685_v51 }
  0x56   : > { %548 = vmatpush3.msra.mxu0 %v328_v7 }
  0x57   : > { %549 = vmatprep.subr.mxu0 %v685_v51 }
  0x58   : > { %550 = vmatpush3.msra.mxu0 %v327_v10 }
  0x59   : > { %551 = vmatprep.subr.mxu0 %v685_v51 }
  0x5a   : > { %552 = vmatpush3.msra.mxu0 %v326_v11 }
  0xb3   : > { %v283_v46 = vpop.permute.xlu0 %282 }
  0xb4   : > { %v284_v47 = vadd.f32 %v283_v46, %v280_v44 }
  0xb6   : > { %288 = vrot.lane.b32.xlu1 %v284_v47, %s684_s7 }
  0xb7   : > { %v286_v48 = vpop.permute.xlu0 %285 }
  0xb8   : > { %v287_v49 = vmax.f32 %v281_v45, %v286_v48 }
  0xba   : > { %291 = vrot.lane.b32.xlu1 %v287_v49, %s684_s7 }
 0x128   : > { %v289_v54 = vpop.permute.xlu1 %288 }
 0x129   : > { %v290_v55 = vadd.f32 %v289_v54, %v284_v47 }
 0x12b   : > { %294 = vrot.lane.b32.xlu0 %v290_v55, %s686_s22 }
 0x12c   : > { %v292_v58 = vpop.permute.xlu1 %291 }
 0x12d   : > { %v293_v59 = vmax.f32 %v287_v49, %v292_v58 }
 0x12f   : > { %297 = vrot.lane.b32.xlu1 %v293_v59, %s686_s22 }
 0x19d   : > { %v295_v3 = vpop.permute.xlu0 %294 }
 0x19e   : > { %v296_v5 = vadd.f32 %v295_v3, %v290_v55 }
 0x1a0   : > { %300 = vrot.lane.b32.xlu0 %v296_v5, %s688_s19 }
 0x1a1   : > { %v298_v8 = vpop.permute.xlu1 %297 }
 0x1a2   : > { %v299_v9 = vmax.f32 %v293_v59, %v298_v8 }
 0x1a4   : > { %303 = vrot.lane.b32.xlu1 %v299_v9, %s688_s19 }
 0x212   : > { %v301_v13 = vpop.permute.xlu0 %300 }
 0x213   : > { %v302_v15 = vadd.f32 %v301_v13, %v296_v5 }
 0x215   : > { %v306_v17 = vmul.f32 0.00390625, %v302_v15 }
 0x216   : > { %v304_v16 = vpop.permute.xlu1 %303 }
 0x217   : > { %v305_v18 = vmax.f32 %v299_v9, %v304_v16 }
 0x219   : > { %v322_v19 = vsel %vm321_vm3, %v306_v17, %v305_v18 }
 0x21a   : > { %611 = vtanh.f32 %v322_v19 }
 0x227   : > { %v612_v20 = vpop.eup %611 }
 0x228   : > { %554 = vmatmul.mubr.msk.f32.vlgmr.msra.gmra.mxu0 %vm324_vm4, %v612_v20 }
 0x2e8   : > { %v415_v22 = vpop.f32.mrf.mxu0 }
 0x2e9   : > { %v416_v23 = vadd.f32 %v498_v21, %v415_v22 }
 0x2ea   : > { %v555_v4 = vpop.f32.mrf.mxu0 }
 0x2eb   : > { %420 = vst.msk [vmem:[#allocation5] sm:$0x3] %vm419_vm5, %v416_v23 }
 0x2ec PF: > { %p815_p11 = scmp.eq.s32.totalorder %s488_s17, 1  ;;  %s689_s30 = smov [#allocation5]  }
 0x2ed   : > { %s430_s4 = sshll.u32 %s689_s30, 4  ;;  %s431_s4 = int_to_ptr.vmem [resolvable:$true] %s430_s4 }
 0x2ee   : > { %s613_s5 = scalar_lea.vmem %s431_s4, 32  ;;  %p620_p1 = scmp.lt.s32.totalorder %s431_s4, %s431_s4 }
 0x2ef   : > { %p614_p12 = scmp.ne.s32.totalorder %s431_s4, %s613_s5  ;;  %p621_p2 = scmp.lt.s32.totalorder %s613_s5, %s613_s5 }
 0x2f1   : > { %p615_p13 = pnand %p614_p12, %p815_p11  ;;  %p622_p3 = por %p621_p2, %p620_p1 }
 0x2f3   : > { %p616_p0 = pneg %p615_p13 }
 0x2f5   : > { %p623_p4 = pnand %p622_p3, %p616_p0 }
 0x2f7   : > { %626 = shalt.err (!%p623_p4)
}
 0x2f8   : > { %557 = dma.vmem_to_hbm [thread:$0]  (%p815_p11), %s431_s4, 32, %s848_s3, [#allocation6]  }
 0x2f9   : > { %658 = dma.done.wait (%p815_p11), [#allocation6], 32  }
 0x2fa   : > { %660 = vsyncadd (%p815_p11), [#allocation6], 4294967264 }
 0x2fb PF: > { %s14_s16 = sadd.s32 1, %s679_s16   ;;  %s850_s12 = smov %s667_s13 }
 0x2fc   : > { %p11_p5 = scmp.ge.s32.totalorder %s14_s16, 4   ;;  %s851_s13 = smov %s746_s21 }
 0x2fd   : > { %s852_s14 = smov %s675_s15  ;;  %s853_s15 = smov %s855_s18 }
 0x2fe   :  { %13 = sbr.rel (!%p11_p5) target bundleno = 3 (0x3), region = 111 }
 0x303   :  { %443 = vsyncpa [#allocation6], 1 }
 0x304   :  { %445 = vsyncpa [#allocation6 + $0x1], 1 }

</bundles_post_ra>
